<compile_context>
chip_gen: v7x
topology: tpu7x:2x2x1
jax: 0.10.0
libtpu: 0.0.40
codegen_flags: <defaults>
</compile_context>

<pallas_src>
from functools import partial

import numpy as np
import jax
import jax.numpy as jnp
from jax.experimental import pallas as pl
from jax.experimental.pallas import tpu as pltpu

EPS = 1e-3                       # BatchNorm1d eps (reference uses eps=0.001)
MAX_ROW_TILE = 1024              # pillar rows per grid step
MM_DTYPE = jnp.bfloat16          # MXU input dtype (f32 accumulation)
VMEM_LIMIT = 48 * 1024 * 1024    # fits v7x (64 MiB phys); plenty on v5e/v6e


# ------------- Z branch kernel: up_dimension -> ZBAM -> bin_shuffle ----------
def _z_branch_kernel(x_ref,
                     w1_ref, b1_ref, w2_ref, b2_ref,
                     wa1_ref, ba1_ref, wa2_ref, ba2_ref,
                     wb1_ref, bb1_ref, wb2_ref, bb2_ref,
                     out_ref, feat_ref):
    x = x_ref[...]                                   # [T, nb*5] f32, bin-major
    tn = x.shape[0]
    nbc = feat_ref.shape[-1]                         # nb*C
    cc = out_ref.shape[-1]                           # C
    nb = nbc // cc

    # up_dimension as block-diagonal matmuls (lane-dense, rows stay at T).
    # First matmul kept in f32 (raw voxel features); the rest run bf16 on the MXU.
    h = jnp.maximum(
        jnp.dot(x, w1_ref[...], preferred_element_type=jnp.float32) + b1_ref[...], 0.0)
    y = jnp.dot(h.astype(MM_DTYPE), w2_ref[...],
                preferred_element_type=jnp.float32) + b2_ref[...]       # [T, nb*C] f32

    # ZBAM pooling over the bin axis.
    # TODO(synk): ZBAM source is not in the reference file; implemented as a
    # standard CBAM channel attention (avg+max pool over bins, shared MLP, sigmoid).
    if (nb & (nb - 1)) == 0:
        # log2 lane-roll reduction tree on the XLU; result lives in lanes [:C].
        s, m = y, y
        shift = nbc // 2
        while shift >= cc:
            s = s + pltpu.roll(s, shift, 1)
            m = jnp.maximum(m, pltpu.roll(m, shift, 1))
            shift //= 2
        s = s[:, :cc]
        m = m[:, :cc]
    else:
        s = y[:, :cc]
        m = y[:, :cc]
        for b in range(1, nb):
            blk = y[:, b * cc:(b + 1) * cc]
            s = s + blk
            m = jnp.maximum(m, blk)
    avg = s * (1.0 / nb)                             # [T, C]
    mx = m                                           # [T, C]

    # Shared attention MLP, one stacked pass over [avg; max].
    pooled = jnp.concatenate([avg, mx], axis=0).astype(MM_DTYPE)        # [2T, C]
    a = jnp.maximum(
        jnp.dot(pooled, wa1_ref[...], preferred_element_type=jnp.float32) + ba1_ref[...], 0.0)
    sc = jnp.dot(a.astype(MM_DTYPE), wa2_ref[...],
                 preferred_element_type=jnp.float32) + ba2_ref[...]     # [2T, C]
    att = jax.nn.sigmoid(sc[:tn] + sc[tn:])                             # [T, C]

    # Apply per-channel attention across all bins (lane-tile, stays lane-dense).
    y = y * jnp.concatenate([att] * nb, axis=-1)                        # [T, nb*C]

    # Heavy writeback in bf16, lane-dense.
    feat_ref[...] = y.astype(feat_ref.dtype)

    # bin_shuffle: Linear(no bias)+BN+ReLU x2, with BN folded into weights host-side.
    z = jnp.maximum(
        jnp.dot(y.astype(MM_DTYPE), wb1_ref[...],
                preferred_element_type=jnp.float32) + bb1_ref[...], 0.0)
    z = jnp.maximum(
        jnp.dot(z.astype(MM_DTYPE), wb2_ref[...],
                preferred_element_type=jnp.float32) + bb2_ref[...], 0.0)
    out_ref[...] = z.astype(out_ref.dtype)


# ------------- T branch kernel: bin_shuffle_t ---------------------------------
def _t_branch_kernel(x_ref, wb1_ref, bb1_ref, wb2_ref, bb2_ref, out_ref):
    x = x_ref[...]                                   # [T, 50] f32
    z = jnp.maximum(
        jnp.dot(x, wb1_ref[...], preferred_element_type=jnp.float32) + bb1_ref[...], 0.0)
    z = jnp.maximum(
        jnp.dot(z.astype(MM_DTYPE), wb2_ref[...],
                preferred_element_type=jnp.float32) + bb2_ref[...], 0.0)
    out_ref[...] = z.astype(out_ref.dtype)


# ---------------------------- wrappers ----------------------------------------
def _round_up(n, m):
    return ((n + m - 1) // m) * m


def _choose_tile(n):
    # Multiple of 8 sublanes; at least two grid steps when possible so the
    # ("parallel",) axis actually splits across both TensorCores on v7x.
    half = _round_up(max((n + 1) // 2, 1), 8)
    return max(8, min(MAX_ROW_TILE, half))


def _pad_rows(x, tile):
    n = x.shape[0]
    npad = _round_up(max(n, 1), tile)
    if npad != n:
        x = jnp.pad(x, [(0, npad - n)] + [(0, 0)] * (x.ndim - 1))
    return x, n


def z_branch(x_flat, p, num_bins):
    """x_flat: [N, num_bins*5] bin-major -> ([N, C] f32, [N, num_bins, C] bf16)."""
    tile = _choose_tile(x_flat.shape[0])
    xp, n = _pad_rows(x_flat, tile)
    npad, din = xp.shape
    c = p['wb2'].shape[1]
    nb = num_bins
    weights = (p['w1'], p['b1'], p['w2'], p['b2'],
               p['wa1'], p['ba1'], p['wa2'], p['ba2'],
               p['wb1'], p['bb1'], p['wb2'], p['bb2'])
    in_specs = [pl.BlockSpec((tile, din), lambda i: (i, 0))]
    in_specs += [pl.BlockSpec(w.shape, lambda i: (0, 0)) for w in weights]
    out, feat_flat = pl.pallas_call(
        _z_branch_kernel,
        grid=(npad // tile,),
        in_specs=in_specs,
        out_specs=(pl.BlockSpec((tile, c), lambda i: (i, 0)),
                   pl.BlockSpec((tile, nb * c), lambda i: (i, 0))),
        out_shape=(jax.ShapeDtypeStruct((npad, c), jnp.float32),
                   jax.ShapeDtypeStruct((npad, nb * c), jnp.bfloat16)),
        compiler_params=pltpu.CompilerParams(
            dimension_semantics=("parallel",),
            vmem_limit_bytes=VMEM_LIMIT),
    )(xp, *weights)
    return out[:n], feat_flat[:n].reshape(n, nb, c)


def t_branch(x_flat, p):
    """x_flat: [N, 50] -> bin_shuffle_t output [N, C]."""
    tile = _choose_tile(x_flat.shape[0])
    xp, n = _pad_rows(x_flat, tile)
    npad, din = xp.shape
    c = p['wb2'].shape[1]
    weights = (p['wb1'], p['bb1'], p['wb2'], p['bb2'])
    in_specs = [pl.BlockSpec((tile, din), lambda i: (i, 0))]
    in_specs += [pl.BlockSpec(w.shape, lambda i: (0, 0)) for w in weights]
    out = pl.pallas_call(
        _t_branch_kernel,
        grid=(npad // tile,),
        in_specs=in_specs,
        out_specs=pl.BlockSpec((tile, c), lambda i: (i, 0)),
        out_shape=jax.ShapeDtypeStruct((npad, c), jnp.float32),
        compiler_params=pltpu.CompilerParams(
            dimension_semantics=("parallel",),
            vmem_limit_bytes=VMEM_LIMIT),
    )(xp, *weights)
    return out[:n]


# ---------------------------- parameter init ----------------------------------
def init_params(key, output_channel=32, num_bins=8):
    C = output_channel
    H = C // 2
    ks = iter(jax.random.split(key, 32))

    def lin(fan_in, fan_out):
        b = 1.0 / np.sqrt(fan_in)
        return jax.random.uniform(next(ks), (fan_in, fan_out), jnp.float32, -b, b)

    def bias(fan_in, dim):
        b = 1.0 / np.sqrt(fan_in)
        return jax.random.uniform(next(ks), (1, dim), jnp.float32, -b, b)

    def bn(dim):  # eval-mode BatchNorm1d stats
        gamma = 1.0 + 0.1 * jax.random.uniform(next(ks), (1, dim), jnp.float32)
        beta = 0.1 * jax.random.normal(next(ks), (1, dim), jnp.float32)
        mean = 0.05 * jax.random.normal(next(ks), (1, dim), jnp.float32)
        var = 1.0 + 0.1 * jax.random.uniform(next(ks), (1, dim), jnp.float32)
        return gamma, beta, mean, var

    p = {}
    # up_dimension: Linear(5,H)+bias+ReLU, Linear(H,C)+bias (no ReLU on last layer)
    p['w1'], p['b1'] = lin(5, H), bias(5, H)
    p['w2'], p['b2'] = lin(H, C), bias(H, C)
    # ZBAM shared attention MLP (C -> C//2 -> C)
    p['wa1'], p['ba1'] = lin(C, C // 2), bias(C, C // 2)
    p['wa2'], p['ba2'] = lin(C // 2, C), bias(C // 2, C)
    # bin_shuffle: Linear(C*num_bins, C*num_bins//2, no bias)+BN+ReLU, Linear(->C, no bias)+BN+ReLU
    din = C * num_bins
    wb1_torch = lin(din, din // 2)            # rows indexed c*num_bins + b (torch view of [N,C,Z])
    idx = jnp.arange(din)
    perm = (idx % C) * num_bins + (idx // C)  # map kernel order b*C+c -> torch order c*num_bins+b
    p['wb1'] = wb1_torch[perm]
    p['g1'], p['be1'], p['m1'], p['v1'] = bn(din // 2)
    p['wb2'] = lin(din // 2, C)
    p['g2'], p['be2'], p['m2'], p['v2'] = bn(C)
    return p


def init_params_t(key, output_channel=32):
    C = output_channel
    ks = iter(jax.random.split(key, 16))

    def lin(fan_in, fan_out):
        b = 1.0 / np.sqrt(fan_in)
        return jax.random.uniform(next(ks), (fan_in, fan_out), jnp.float32, -b, b)

    def bn(dim):
        gamma = 1.0 + 0.1 * jax.random.uniform(next(ks), (1, dim), jnp.float32)
        beta = 0.1 * jax.random.normal(next(ks), (1, dim), jnp.float32)
        mean = 0.05 * jax.random.normal(next(ks), (1, dim), jnp.float32)
        var = 1.0 + 0.1 * jax.random.uniform(next(ks), (1, dim), jnp.float32)
        return gamma, beta, mean, var

    p = {}
    p['wb1'] = lin(50, 25)                    # bin_shuffle_t: 5*10 -> 25
    p['g1'], p['be1'], p['m1'], p['v1'] = bn(25)
    p['wb2'] = lin(25, C)
    p['g2'], p['be2'], p['m2'], p['v2'] = bn(C)
    return p


# -------------- host-side param prep (block-diag, BN folding, bf16) -----------
def _fold_bn(w, gamma, beta, mean, var):
    """Fold eval-mode BatchNorm1d into the preceding no-bias Linear."""
    scale = gamma * jax.lax.rsqrt(var + EPS)                 # (1, dim)
    return w * scale, beta - mean * scale


def prepare_params_z(p, num_bins=8):
    nb = num_bins
    eye = jnp.eye(nb, dtype=jnp.float32)
    q = {}
    # up_dimension as block-diagonal weights for the bin-major flat input.
    q['w1'] = jnp.kron(eye, p['w1'])                         # [nb*5, nb*H]  (f32: precision)
    q['b1'] = jnp.tile(p['b1'], (1, nb))
    q['w2'] = jnp.kron(eye, p['w2']).astype(MM_DTYPE)        # [nb*H, nb*C]
    q['b2'] = jnp.tile(p['b2'], (1, nb))
    # ZBAM attention MLP.
    q['wa1'], q['ba1'] = p['wa1'].astype(MM_DTYPE), p['ba1']
    q['wa2'], q['ba2'] = p['wa2'].astype(MM_DTYPE), p['ba2']
    # bin_shuffle with BN folded (rows already permuted to kernel order in init).
    wb1, bb1 = _fold_bn(p['wb1'], p['g1'], p['be1'], p['m1'], p['v1'])
    wb2, bb2 = _fold_bn(p['wb2'], p['g2'], p['be2'], p['m2'], p['v2'])
    q['wb1'], q['bb1'] = wb1.astype(MM_DTYPE), bb1
    q['wb2'], q['bb2'] = wb2.astype(MM_DTYPE), bb2
    return q


def prepare_params_t(p):
    q = {}
    wb1, bb1 = _fold_bn(p['wb1'], p['g1'], p['be1'], p['m1'], p['v1'])
    wb2, bb2 = _fold_bn(p['wb2'], p['g2'], p['be2'], p['m2'], p['v2'])
    q['wb1'], q['bb1'] = wb1, bb1                            # f32 first matmul (raw features)
    q['wb2'], q['bb2'] = wb2.astype(MM_DTYPE), bb2
    return q


# ---------------------------- binning glue (plain JAX, static shapes) ----------
def binning(voxels, voxel_coords, num_unq, unq_inv, num_bins):
    """voxels [M, F]; voxel_coords [M, 2] with (:,0)=batch idx, (:,1)=bin idx."""
    M, F = voxels.shape
    src = jnp.zeros((num_unq, num_bins, F + 1), jnp.float32)
    src = src.at[:, :, 0].set(-1.0)
    src = src.at[unq_inv, voxel_coords[:, 1], 1:].set(voxels)
    src = src.at[unq_inv, voxel_coords[:, 1], 0].set(voxel_coords[:, 0].astype(jnp.float32))
    return src


# ---------------------------- HCBAM forward ------------------------------------
@partial(jax.jit, static_argnames=("num_bins", "num_bins_t", "n_unq_v", "n_unq_t"))
def _hcbam_core(voxel_features, voxel_coords, v_unq_inv,
                toxel_features, toxel_coords, t_unq_inv,
                params_z, params_t,
                num_bins, num_bins_t, n_unq_v, n_unq_t):
    # --- Z (voxel) branch: fully static-shaped, runs on all num_unq rows ---
    src = binning(voxel_features, voxel_coords, n_unq_v, v_unq_inv, num_bins)
    mlp_bxyz = src[:, :, :4]
    x_flat = src[:, :, 1:].reshape(n_unq_v, num_bins * 5)    # bin-major, lane-dense
    feat_z, mlp_feat = z_branch(x_flat, params_z, num_bins)

    # --- T (temporal) branch ---
    src_t = binning(toxel_features, toxel_coords, n_unq_t, t_unq_inv, num_bins_t)
    mlp_bxyt = src_t[:, :, :4]
    xt = src_t[:, :, 1:]                                     # [Nt, 10, 5]
    flat_t = xt.reshape(n_unq_t, num_bins_t * 5)             # torch .view(N, T*C) order
    feat_t = t_branch(flat_t, params_t)
    return feat_z, mlp_feat, mlp_bxyz, feat_t, mlp_bxyt, xt


def hcbam_forward(data, params_z, params_t, num_bins=8):
    occ = data['v_feat_unq_cnt'] >= 2
    occ_t = data['t_feat_unq_cnt'] >= 2
    (feat_z_full, mlp_feat_full, bxyz_full,
     feat_t_full, bxyt_full, xt_full) = _hcbam_core(
        data['voxel_features'], data['voxel_features_coords'], data['v_feat_unq_inv'],
        data['toxel_features'], data['toxel_features_coords'], data['t_feat_unq_inv'],
        params_z, params_t,
        num_bins=num_bins, num_bins_t=10,
        n_unq_v=int(data['v_num_unq']), n_unq_t=int(data['t_num_unq']))

    # All per-row compute happened under one jit at static shapes; the boolean
    # compaction (torch's `src[occupied_mask]`) is the only dynamic-shape step
    # and is applied to the outputs, which is equivalent for row-wise ops.
    feat_z = feat_z_full[occ]
    feat_t = feat_t_full[occ_t]
    extras = {'mlp_bxyz': bxyz_full[occ],
              'mlp_feat': mlp_feat_full[occ],     # bf16 (halved HBM writeback)
              'mlp_bxyt': bxyt_full[occ_t],
              'mlp_feat_t': xt_full[occ_t]}
    return feat_z, occ, feat_t, occ_t, extras


# ---------------------------- main ---------------------------------------------
if __name__ == "__main__":
    key = jax.random.PRNGKey(0)
    k_pz, k_pt, k_vox, k_tox = jax.random.split(key, 4)

    num_bins, C = 8, 32          # input_channel == output_channel == 32

    # synthetic voxel (z) scatter structure: 12 pillars, 10 with 4 voxels, 2 with 1
    v_counts = np.array([4] * 10 + [1] * 2, dtype=np.int32)
    v_unq_inv = np.repeat(np.arange(12), v_counts)
    v_bins = np.concatenate([np.arange(c) for c in v_counts]).astype(np.int32)
    v_batch = (np.arange(12) % 2)[v_unq_inv]
    voxel_coords = jnp.asarray(np.stack([v_batch, v_bins], axis=1), dtype=jnp.int32)
    voxel_features = jax.random.normal(k_vox, (v_unq_inv.shape[0], 5), jnp.float32)

    # synthetic toxel (t) scatter structure: 9 entries, 7 with 3 toxels, 2 with 1
    t_counts = np.array([3] * 7 + [1] * 2, dtype=np.int32)
    t_unq_inv = np.repeat(np.arange(9), t_counts)
    t_bins = np.concatenate([np.arange(c) for c in t_counts]).astype(np.int32)
    t_batch = (np.arange(9) % 2)[t_unq_inv]
    toxel_coords = jnp.asarray(np.stack([t_batch, t_bins], axis=1), dtype=jnp.int32)
    toxel_features = jax.random.normal(k_tox, (t_unq_inv.shape[0], 5), jnp.float32)

    data = {
        'voxel_features': voxel_features,
        'voxel_features_coords': voxel_coords,
        'v_feat_unq_inv': jnp.asarray(v_unq_inv, dtype=jnp.int32),
        'v_feat_unq_cnt': jnp.asarray(v_counts, dtype=jnp.int32),
        'v_num_unq': 12,
        'toxel_features': toxel_features,
        'toxel_features_coords': toxel_coords,
        't_feat_unq_inv': jnp.asarray(t_unq_inv, dtype=jnp.int32),
        't_feat_unq_cnt': jnp.asarray(t_counts, dtype=jnp.int32),
        't_num_unq': 9,
    }

    # host-side, one-time: init + block-diag construction + BN folding + bf16 cast
    params_z = prepare_params_z(init_params(k_pz, output_channel=C, num_bins=num_bins),
                                num_bins=num_bins)
    params_t = prepare_params_t(init_params_t(k_pt, output_channel=C))

    src, occ, src_t, occ_t, extras = hcbam_forward(data, params_z, params_t, num_bins=num_bins)
    jax.block_until_ready((src, src_t, extras['mlp_feat']))

    assert src.shape == (int(occ.sum()), C)
    assert src_t.shape == (int(occ_t.sum()), C)
    assert extras['mlp_feat'].shape == (int(occ.sum()), num_bins, C)
    assert bool(jnp.all(jnp.isfinite(src))) and bool(jnp.all(jnp.isfinite(src_t)))
    print("KERNEL_OK")
</pallas_src>

<mosaic_0001>
module attributes {stable_mosaic.version = 11 : i64} {
  func.func @_z_branch_kernel(%arg0: i32, %arg1: memref<8x40xf32, #tpu.memory_space<vmem>>, %arg2: memref<40x128xf32, #tpu.memory_space<vmem>>, %arg3: memref<1x128xf32, #tpu.memory_space<vmem>>, %arg4: memref<128x256xbf16, #tpu.memory_space<vmem>>, %arg5: memref<1x256xf32, #tpu.memory_space<vmem>>, %arg6: memref<32x16xbf16, #tpu.memory_space<vmem>>, %arg7: memref<1x16xf32, #tpu.memory_space<vmem>>, %arg8: memref<16x32xbf16, #tpu.memory_space<vmem>>, %arg9: memref<1x32xf32, #tpu.memory_space<vmem>>, %arg10: memref<256x128xbf16, #tpu.memory_space<vmem>>, %arg11: memref<1x128xf32, #tpu.memory_space<vmem>>, %arg12: memref<128x32xbf16, #tpu.memory_space<vmem>>, %arg13: memref<1x32xf32, #tpu.memory_space<vmem>>, %arg14: memref<8x32xf32, #tpu.memory_space<vmem>>, %arg15: memref<8x256xbf16, #tpu.memory_space<vmem>>) attributes {dimension_semantics = [#tpu.dimension_semantics<parallel>], iteration_bounds = array<i64: 2>, scalar_prefetch = 0 : i64, scratch_operands = 0 : i64, tpu.core_type = #tpu.core_type<tc>, window_params = [{transform_indices = @transform_0, window_bounds = array<i64: 8, 40>}, {pipeline_mode = #tpu.pipeline_mode<synchronous>, transform_indices = @transform_1, window_bounds = array<i64: 40, 128>}, {pipeline_mode = #tpu.pipeline_mode<synchronous>, transform_indices = @transform_2, window_bounds = array<i64: 1, 128>}, {pipeline_mode = #tpu.pipeline_mode<synchronous>, transform_indices = @transform_3, window_bounds = array<i64: 128, 256>}, {pipeline_mode = #tpu.pipeline_mode<synchronous>, transform_indices = @transform_4, window_bounds = array<i64: 1, 256>}, {pipeline_mode = #tpu.pipeline_mode<synchronous>, transform_indices = @transform_5, window_bounds = array<i64: 32, 16>}, {pipeline_mode = #tpu.pipeline_mode<synchronous>, transform_indices = @transform_6, window_bounds = array<i64: 1, 16>}, {pipeline_mode = #tpu.pipeline_mode<synchronous>, transform_indices = @transform_7, window_bounds = array<i64: 16, 32>}, {pipeline_mode = #tpu.pipeline_mode<synchronous>, transform_indices = @transform_8, window_bounds = array<i64: 1, 32>}, {pipeline_mode = #tpu.pipeline_mode<synchronous>, transform_indices = @transform_9, window_bounds = array<i64: 256, 128>}, {pipeline_mode = #tpu.pipeline_mode<synchronous>, transform_indices = @transform_10, window_bounds = array<i64: 1, 128>}, {pipeline_mode = #tpu.pipeline_mode<synchronous>, transform_indices = @transform_11, window_bounds = array<i64: 128, 32>}, {pipeline_mode = #tpu.pipeline_mode<synchronous>, transform_indices = @transform_12, window_bounds = array<i64: 1, 32>}, {transform_indices = @transform_13, window_bounds = array<i64: 8, 32>}, {transform_indices = @transform_14, window_bounds = array<i64: 8, 256>}]} {
    %c0 = arith.constant 0 : index
    %c0_0 = arith.constant 0 : index
    %0 = vector.load %arg1[%c0, %c0_0] : memref<8x40xf32, #tpu.memory_space<vmem>>, vector<8x40xf32>
    %c0_1 = arith.constant 0 : index
    %c0_2 = arith.constant 0 : index
    %1 = vector.load %arg2[%c0_1, %c0_2] : memref<40x128xf32, #tpu.memory_space<vmem>>, vector<40x128xf32>
    %cst = arith.constant dense<0.000000e+00> : vector<8x128xf32>
    %2 = tpu.matmul %0, %1, %cst {dimension_numbers = #tpu.dot_dimension_numbers<[1], [0], [0], [1], [0, 0, 1, 1], [], []>} : vector<8x40xf32>, vector<40x128xf32>, vector<8x128xf32> -> vector<8x128xf32>
    %c0_3 = arith.constant 0 : index
    %c0_4 = arith.constant 0 : index
    %3 = vector.load %arg3[%c0_3, %c0_4] : memref<1x128xf32, #tpu.memory_space<vmem>>, vector<1x128xf32>
    %4 = vector.broadcast %3 : vector<1x128xf32> to vector<8x128xf32>
    %5 = arith.addf %2, %4 : vector<8x128xf32>
    %cst_5 = arith.constant 0.000000e+00 : f32
    %6 = vector.broadcast %cst_5 : f32 to vector<8x128xf32>
    %7 = arith.maximumf %5, %6 : vector<8x128xf32>
    %8 = arith.truncf %7 : vector<8x128xf32> to vector<8x128xbf16>
    %c0_6 = arith.constant 0 : index
    %c0_7 = arith.constant 0 : index
    %9 = vector.load %arg4[%c0_6, %c0_7] : memref<128x256xbf16, #tpu.memory_space<vmem>>, vector<128x256xbf16>
    %cst_8 = arith.constant dense<0.000000e+00> : vector<8x256xf32>
    %10 = tpu.matmul %8, %9, %cst_8 {dimension_numbers = #tpu.dot_dimension_numbers<[1], [0], [0], [1], [0, 0, 1, 1], [], []>} : vector<8x128xbf16>, vector<128x256xbf16>, vector<8x256xf32> -> vector<8x256xf32>
    %c0_9 = arith.constant 0 : index
    %c0_10 = arith.constant 0 : index
    %11 = vector.load %arg5[%c0_9, %c0_10] : memref<1x256xf32, #tpu.memory_space<vmem>>, vector<1x256xf32>
    %12 = vector.broadcast %11 : vector<1x256xf32> to vector<8x256xf32>
    %13 = arith.addf %10, %12 : vector<8x256xf32>
    %c128_i32 = arith.constant 128 : i32
    %14 = tpu.dynamic_rotate %13 by %c128_i32 dim 1 : vector<8x256xf32>, i32 -> vector<8x256xf32>
    %15 = arith.addf %13, %14 : vector<8x256xf32>
    %c128_i32_11 = arith.constant 128 : i32
    %16 = tpu.dynamic_rotate %13 by %c128_i32_11 dim 1 : vector<8x256xf32>, i32 -> vector<8x256xf32>
    %17 = arith.maximumf %13, %16 : vector<8x256xf32>
    %c64_i32 = arith.constant 64 : i32
    %18 = tpu.dynamic_rotate %15 by %c64_i32 dim 1 : vector<8x256xf32>, i32 -> vector<8x256xf32>
    %19 = arith.addf %15, %18 : vector<8x256xf32>
    %c64_i32_12 = arith.constant 64 : i32
    %20 = tpu.dynamic_rotate %17 by %c64_i32_12 dim 1 : vector<8x256xf32>, i32 -> vector<8x256xf32>
    %21 = arith.maximumf %17, %20 : vector<8x256xf32>
    %c32_i32 = arith.constant 32 : i32
    %22 = tpu.dynamic_rotate %19 by %c32_i32 dim 1 : vector<8x256xf32>, i32 -> vector<8x256xf32>
    %23 = arith.addf %19, %22 : vector<8x256xf32>
    %c32_i32_13 = arith.constant 32 : i32
    %24 = tpu.dynamic_rotate %21 by %c32_i32_13 dim 1 : vector<8x256xf32>, i32 -> vector<8x256xf32>
    %25 = arith.maximumf %21, %24 : vector<8x256xf32>
    %26 = vector.extract_strided_slice %23 {offsets = [0, 0], sizes = [8, 32], strides = [1, 1]} : vector<8x256xf32> to vector<8x32xf32>
    %27 = vector.extract_strided_slice %25 {offsets = [0, 0], sizes = [8, 32], strides = [1, 1]} : vector<8x256xf32> to vector<8x32xf32>
    %cst_14 = arith.constant 1.250000e-01 : f32
    %28 = vector.broadcast %cst_14 : f32 to vector<8x32xf32>
    %29 = arith.mulf %26, %28 : vector<8x32xf32>
    %30 = tpu.concatenate %29, %27 in 0 : vector<8x32xf32>, vector<8x32xf32> -> vector<16x32xf32>
    %31 = arith.truncf %30 : vector<16x32xf32> to vector<16x32xbf16>
    %c0_15 = arith.constant 0 : index
    %c0_16 = arith.constant 0 : index
    %32 = vector.load %arg6[%c0_15, %c0_16] : memref<32x16xbf16, #tpu.memory_space<vmem>>, vector<32x16xbf16>
    %cst_17 = arith.constant dense<0.000000e+00> : vector<16x16xf32>
    %33 = tpu.matmul %31, %32, %cst_17 {dimension_numbers = #tpu.dot_dimension_numbers<[1], [0], [0], [1], [0, 0, 1, 1], [], []>} : vector<16x32xbf16>, vector<32x16xbf16>, vector<16x16xf32> -> vector<16x16xf32>
    %c0_18 = arith.constant 0 : index
    %c0_19 = arith.constant 0 : index
    %34 = vector.load %arg7[%c0_18, %c0_19] : memref<1x16xf32, #tpu.memory_space<vmem>>, vector<1x16xf32>
    %35 = vector.broadcast %34 : vector<1x16xf32> to vector<16x16xf32>
    %36 = arith.addf %33, %35 : vector<16x16xf32>
    %cst_20 = arith.constant 0.000000e+00 : f32
    %37 = vector.broadcast %cst_20 : f32 to vector<16x16xf32>
    %38 = arith.maximumf %36, %37 : vector<16x16xf32>
    %39 = arith.truncf %38 : vector<16x16xf32> to vector<16x16xbf16>
    %c0_21 = arith.constant 0 : index
    %c0_22 = arith.constant 0 : index
    %40 = vector.load %arg8[%c0_21, %c0_22] : memref<16x32xbf16, #tpu.memory_space<vmem>>, vector<16x32xbf16>
    %cst_23 = arith.constant dense<0.000000e+00> : vector<16x32xf32>
    %41 = tpu.matmul %39, %40, %cst_23 {dimension_numbers = #tpu.dot_dimension_numbers<[1], [0], [0], [1], [0, 0, 1, 1], [], []>} : vector<16x16xbf16>, vector<16x32xbf16>, vector<16x32xf32> -> vector<16x32xf32>
    %c0_24 = arith.constant 0 : index
    %c0_25 = arith.constant 0 : index
    %42 = vector.load %arg9[%c0_24, %c0_25] : memref<1x32xf32, #tpu.memory_space<vmem>>, vector<1x32xf32>
    %43 = vector.broadcast %42 : vector<1x32xf32> to vector<16x32xf32>
    %44 = arith.addf %41, %43 : vector<16x32xf32>
    %45 = vector.extract_strided_slice %44 {offsets = [0, 0], sizes = [8, 32], strides = [1, 1]} : vector<16x32xf32> to vector<8x32xf32>
    %46 = vector.extract_strided_slice %44 {offsets = [8, 0], sizes = [8, 32], strides = [1, 1]} : vector<16x32xf32> to vector<8x32xf32>
    %47 = arith.addf %45, %46 : vector<8x32xf32>
    %48 = arith.negf %47 : vector<8x32xf32>
    %49 = math.exp %48 : vector<8x32xf32>
    %cst_26 = arith.constant 1.000000e+00 : f32
    %50 = vector.broadcast %cst_26 : f32 to vector<8x32xf32>
    %51 = arith.addf %50, %49 : vector<8x32xf32>
    %52 = arith.divf %50, %51 : vector<8x32xf32>
    %53 = tpu.concatenate %52, %52, %52, %52, %52, %52, %52, %52 in 1 : vector<8x32xf32>, vector<8x32xf32>, vector<8x32xf32>, vector<8x32xf32>, vector<8x32xf32>, vector<8x32xf32>, vector<8x32xf32>, vector<8x32xf32> -> vector<8x256xf32>
    %54 = arith.mulf %13, %53 : vector<8x256xf32>
    %55 = arith.truncf %54 : vector<8x256xf32> to vector<8x256xbf16>
    %c0_27 = arith.constant 0 : index
    %c0_28 = arith.constant 0 : index
    %56 = vector.load %arg15[%c0_27, %c0_28] : memref<8x256xbf16, #tpu.memory_space<vmem>>, vector<8x256xbf16>
    tpu.vector_store %arg15[%c0_27, %c0_28], %55 {strides = array<i32>} : memref<8x256xbf16, #tpu.memory_space<vmem>>, vector<8x256xbf16>,
    %57 = arith.truncf %54 : vector<8x256xf32> to vector<8x256xbf16>
    %c0_29 = arith.constant 0 : index
    %c0_30 = arith.constant 0 : index
    %58 = vector.load %arg10[%c0_29, %c0_30] : memref<256x128xbf16, #tpu.memory_space<vmem>>, vector<256x128xbf16>
    %cst_31 = arith.constant dense<0.000000e+00> : vector<8x128xf32>
    %59 = tpu.matmul %57, %58, %cst_31 {dimension_numbers = #tpu.dot_dimension_numbers<[1], [0], [0], [1], [0, 0, 1, 1], [], []>} : vector<8x256xbf16>, vector<256x128xbf16>, vector<8x128xf32> -> vector<8x128xf32>
    %c0_32 = arith.constant 0 : index
    %c0_33 = arith.constant 0 : index
    %60 = vector.load %arg11[%c0_32, %c0_33] : memref<1x128xf32, #tpu.memory_space<vmem>>, vector<1x128xf32>
    %61 = vector.broadcast %60 : vector<1x128xf32> to vector<8x128xf32>
    %62 = arith.addf %59, %61 : vector<8x128xf32>
    %cst_34 = arith.constant 0.000000e+00 : f32
    %63 = vector.broadcast %cst_34 : f32 to vector<8x128xf32>
    %64 = arith.maximumf %62, %63 : vector<8x128xf32>
    %65 = arith.truncf %64 : vector<8x128xf32> to vector<8x128xbf16>
    %c0_35 = arith.constant 0 : index
    %c0_36 = arith.constant 0 : index
    %66 = vector.load %arg12[%c0_35, %c0_36] : memref<128x32xbf16, #tpu.memory_space<vmem>>, vector<128x32xbf16>
    %cst_37 = arith.constant dense<0.000000e+00> : vector<8x32xf32>
    %67 = tpu.matmul %65, %66, %cst_37 {dimension_numbers = #tpu.dot_dimension_numbers<[1], [0], [0], [1], [0, 0, 1, 1], [], []>} : vector<8x128xbf16>, vector<128x32xbf16>, vector<8x32xf32> -> vector<8x32xf32>
    %c0_38 = arith.constant 0 : index
    %c0_39 = arith.constant 0 : index
    %68 = vector.load %arg13[%c0_38, %c0_39] : memref<1x32xf32, #tpu.memory_space<vmem>>, vector<1x32xf32>
    %69 = vector.broadcast %68 : vector<1x32xf32> to vector<8x32xf32>
    %70 = arith.addf %67, %69 : vector<8x32xf32>
    %cst_40 = arith.constant 0.000000e+00 : f32
    %71 = vector.broadcast %cst_40 : f32 to vector<8x32xf32>
    %72 = arith.maximumf %70, %71 : vector<8x32xf32>
    %c0_41 = arith.constant 0 : index
    %c0_42 = arith.constant 0 : index
    %73 = vector.load %arg14[%c0_41, %c0_42] : memref<8x32xf32, #tpu.memory_space<vmem>>, vector<8x32xf32>
    tpu.vector_store %arg14[%c0_41, %c0_42], %72 {strides = array<i32>} : memref<8x32xf32, #tpu.memory_space<vmem>>, vector<8x32xf32>,
    return
  }
  func.func @transform_0(%arg0: i32) -> (i32, i32) {
    %c0_i32 = arith.constant 0 : i32
    %c0_i32_0 = arith.constant 0 : i32
    return %arg0, %c0_i32 : i32, i32
  }
  func.func @transform_1(%arg0: i32) -> (i32, i32) {
    %c0_i32 = arith.constant 0 : i32
    %c0_i32_0 = arith.constant 0 : i32
    %c0_i32_1 = arith.constant 0 : i32
    return %c0_i32, %c0_i32_0 : i32, i32
  }
  func.func @transform_2(%arg0: i32) -> (i32, i32) {
    %c0_i32 = arith.constant 0 : i32
    %c0_i32_0 = arith.constant 0 : i32
    %c0_i32_1 = arith.constant 0 : i32
    return %c0_i32, %c0_i32_0 : i32, i32
  }
  func.func @transform_3(%arg0: i32) -> (i32, i32) {
    %c0_i32 = arith.constant 0 : i32
    %c0_i32_0 = arith.constant 0 : i32
    %c0_i32_1 = arith.constant 0 : i32
    return %c0_i32, %c0_i32_0 : i32, i32
  }
  func.func @transform_4(%arg0: i32) -> (i32, i32) {
    %c0_i32 = arith.constant 0 : i32
    %c0_i32_0 = arith.constant 0 : i32
    %c0_i32_1 = arith.constant 0 : i32
    return %c0_i32, %c0_i32_0 : i32, i32
  }
  func.func @transform_5(%arg0: i32) -> (i32, i32) {
    %c0_i32 = arith.constant 0 : i32
    %c0_i32_0 = arith.constant 0 : i32
    %c0_i32_1 = arith.constant 0 : i32
    return %c0_i32, %c0_i32_0 : i32, i32
  }
  func.func @transform_6(%arg0: i32) -> (i32, i32) {
    %c0_i32 = arith.constant 0 : i32
    %c0_i32_0 = arith.constant 0 : i32
    %c0_i32_1 = arith.constant 0 : i32
    return %c0_i32, %c0_i32_0 : i32, i32
  }
  func.func @transform_7(%arg0: i32) -> (i32, i32) {
    %c0_i32 = arith.constant 0 : i32
    %c0_i32_0 = arith.constant 0 : i32
    %c0_i32_1 = arith.constant 0 : i32
    return %c0_i32, %c0_i32_0 : i32, i32
  }
  func.func @transform_8(%arg0: i32) -> (i32, i32) {
    %c0_i32 = arith.constant 0 : i32
    %c0_i32_0 = arith.constant 0 : i32
    %c0_i32_1 = arith.constant 0 : i32
    return %c0_i32, %c0_i32_0 : i32, i32
  }
  func.func @transform_9(%arg0: i32) -> (i32, i32) {
    %c0_i32 = arith.constant 0 : i32
    %c0_i32_0 = arith.constant 0 : i32
    %c0_i32_1 = arith.constant 0 : i32
    return %c0_i32, %c0_i32_0 : i32, i32
  }
  func.func @transform_10(%arg0: i32) -> (i32, i32) {
    %c0_i32 = arith.constant 0 : i32
    %c0_i32_0 = arith.constant 0 : i32
    %c0_i32_1 = arith.constant 0 : i32
    return %c0_i32, %c0_i32_0 : i32, i32
  }
  func.func @transform_11(%arg0: i32) -> (i32, i32) {
    %c0_i32 = arith.constant 0 : i32
    %c0_i32_0 = arith.constant 0 : i32
    %c0_i32_1 = arith.constant 0 : i32
    return %c0_i32, %c0_i32_0 : i32, i32
  }
  func.func @transform_12(%arg0: i32) -> (i32, i32) {
    %c0_i32 = arith.constant 0 : i32
    %c0_i32_0 = arith.constant 0 : i32
    %c0_i32_1 = arith.constant 0 : i32
    return %c0_i32, %c0_i32_0 : i32, i32
  }
  func.func @transform_13(%arg0: i32) -> (i32, i32) {
    %c0_i32 = arith.constant 0 : i32
    %c0_i32_0 = arith.constant 0 : i32
    return %arg0, %c0_i32 : i32, i32
  }
  func.func @transform_14(%arg0: i32) -> (i32, i32) {
    %c0_i32 = arith.constant 0 : i32
    %c0_i32_0 = arith.constant 0 : i32
    return %arg0, %c0_i32 : i32, i32
  }
}

module attributes {stable_mosaic.version = 11 : i64} {
  func.func @_t_branch_kernel(%arg0: i32, %arg1: memref<8x50xf32, #tpu.memory_space<vmem>>, %arg2: memref<50x25xf32, #tpu.memory_space<vmem>>, %arg3: memref<1x25xf32, #tpu.memory_space<vmem>>, %arg4: memref<25x32xbf16, #tpu.memory_space<vmem>>, %arg5: memref<1x32xf32, #tpu.memory_space<vmem>>, %arg6: memref<8x32xf32, #tpu.memory_space<vmem>>) attributes {dimension_semantics = [#tpu.dimension_semantics<parallel>], iteration_bounds = array<i64: 2>, scalar_prefetch = 0 : i64, scratch_operands = 0 : i64, tpu.core_type = #tpu.core_type<tc>, window_params = [{transform_indices = @transform_0, window_bounds = array<i64: 8, 50>}, {pipeline_mode = #tpu.pipeline_mode<synchronous>, transform_indices = @transform_1, window_bounds = array<i64: 50, 25>}, {pipeline_mode = #tpu.pipeline_mode<synchronous>, transform_indices = @transform_2, window_bounds = array<i64: 1, 25>}, {pipeline_mode = #tpu.pipeline_mode<synchronous>, transform_indices = @transform_3, window_bounds = array<i64: 25, 32>}, {pipeline_mode = #tpu.pipeline_mode<synchronous>, transform_indices = @transform_4, window_bounds = array<i64: 1, 32>}, {transform_indices = @transform_5, window_bounds = array<i64: 8, 32>}]} {
    %c0 = arith.constant 0 : index
    %c0_0 = arith.constant 0 : index
    %0 = vector.load %arg1[%c0, %c0_0] : memref<8x50xf32, #tpu.memory_space<vmem>>, vector<8x50xf32>
    %c0_1 = arith.constant 0 : index
    %c0_2 = arith.constant 0 : index
    %1 = vector.load %arg2[%c0_1, %c0_2] : memref<50x25xf32, #tpu.memory_space<vmem>>, vector<50x25xf32>
    %cst = arith.constant dense<0.000000e+00> : vector<8x25xf32>
    %2 = tpu.matmul %0, %1, %cst {dimension_numbers = #tpu.dot_dimension_numbers<[1], [0], [0], [1], [0, 0, 1, 1], [], []>} : vector<8x50xf32>, vector<50x25xf32>, vector<8x25xf32> -> vector<8x25xf32>
    %c0_3 = arith.constant 0 : index
    %c0_4 = arith.constant 0 : index
    %3 = vector.load %arg3[%c0_3, %c0_4] : memref<1x25xf32, #tpu.memory_space<vmem>>, vector<1x25xf32>
    %4 = vector.broadcast %3 : vector<1x25xf32> to vector<8x25xf32>
    %5 = arith.addf %2, %4 : vector<8x25xf32>
    %cst_5 = arith.constant 0.000000e+00 : f32
    %6 = vector.broadcast %cst_5 : f32 to vector<8x25xf32>
    %7 = arith.maximumf %5, %6 : vector<8x25xf32>
    %8 = arith.truncf %7 : vector<8x25xf32> to vector<8x25xbf16>
    %c0_6 = arith.constant 0 : index
    %c0_7 = arith.constant 0 : index
    %9 = vector.load %arg4[%c0_6, %c0_7] : memref<25x32xbf16, #tpu.memory_space<vmem>>, vector<25x32xbf16>
    %cst_8 = arith.constant dense<0.000000e+00> : vector<8x32xf32>
    %10 = tpu.matmul %8, %9, %cst_8 {dimension_numbers = #tpu.dot_dimension_numbers<[1], [0], [0], [1], [0, 0, 1, 1], [], []>} : vector<8x25xbf16>, vector<25x32xbf16>, vector<8x32xf32> -> vector<8x32xf32>
    %c0_9 = arith.constant 0 : index
    %c0_10 = arith.constant 0 : index
    %11 = vector.load %arg5[%c0_9, %c0_10] : memref<1x32xf32, #tpu.memory_space<vmem>>, vector<1x32xf32>
    %12 = vector.broadcast %11 : vector<1x32xf32> to vector<8x32xf32>
    %13 = arith.addf %10, %12 : vector<8x32xf32>
    %cst_11 = arith.constant 0.000000e+00 : f32
    %14 = vector.broadcast %cst_11 : f32 to vector<8x32xf32>
    %15 = arith.maximumf %13, %14 : vector<8x32xf32>
    %c0_12 = arith.constant 0 : index
    %c0_13 = arith.constant 0 : index
    %16 = vector.load %arg6[%c0_12, %c0_13] : memref<8x32xf32, #tpu.memory_space<vmem>>, vector<8x32xf32>
    tpu.vector_store %arg6[%c0_12, %c0_13], %15 {strides = array<i32>} : memref<8x32xf32, #tpu.memory_space<vmem>>, vector<8x32xf32>,
    return
  }
  func.func @transform_0(%arg0: i32) -> (i32, i32) {
    %c0_i32 = arith.constant 0 : i32
    %c0_i32_0 = arith.constant 0 : i32
    return %arg0, %c0_i32 : i32, i32
  }
  func.func @transform_1(%arg0: i32) -> (i32, i32) {
    %c0_i32 = arith.constant 0 : i32
    %c0_i32_0 = arith.constant 0 : i32
    %c0_i32_1 = arith.constant 0 : i32
    return %c0_i32, %c0_i32_0 : i32, i32
  }
  func.func @transform_2(%arg0: i32) -> (i32, i32) {
    %c0_i32 = arith.constant 0 : i32
    %c0_i32_0 = arith.constant 0 : i32
    %c0_i32_1 = arith.constant 0 : i32
    return %c0_i32, %c0_i32_0 : i32, i32
  }
  func.func @transform_3(%arg0: i32) -> (i32, i32) {
    %c0_i32 = arith.constant 0 : i32
    %c0_i32_0 = arith.constant 0 : i32
    %c0_i32_1 = arith.constant 0 : i32
    return %c0_i32, %c0_i32_0 : i32, i32
  }
  func.func @transform_4(%arg0: i32) -> (i32, i32) {
    %c0_i32 = arith.constant 0 : i32
    %c0_i32_0 = arith.constant 0 : i32
    %c0_i32_1 = arith.constant 0 : i32
    return %c0_i32, %c0_i32_0 : i32, i32
  }
  func.func @transform_5(%arg0: i32) -> (i32, i32) {
    %c0_i32 = arith.constant 0 : i32
    %c0_i32_0 = arith.constant 0 : i32
    return %arg0, %c0_i32 : i32, i32
  }
}

</mosaic_0001>

<bundles_post_ra>
// kernel: _hcbam_core.2
= control target key start
LH: loop header
LB: loop body
LE: loop exit
PB: predicated region body
PF: predicated region fallthrough
CT: control target
= control target key end

     0   :  { %20 = vsyncpa [#allocation3], 0  ;;  %s2014_s0 = inlined_call_operand.vmem [shape: f32[16,40], index: 0, kind: input, shape index: {}]   ;;  %s2015_s1 = inlined_call_operand.vmem [shape: f32[40,128], index: 1, kind: input, shape index: {}]   ;;  %s2016_s2 = inlined_call_operand.vmem [shape: f32[1,128], index: 2, kind: input, shape index: {}]   ;;  %s2017_s3 = inlined_call_operand.vmem [shape: bf16[128,256], index: 3, kind: input, shape index: {}]   ;;  %s2018_s4 = inlined_call_operand.vmem [shape: f32[1,256], index: 4, kind: input, shape index: {}]   ;;  %s2019_s5 = inlined_call_operand.vmem [shape: bf16[32,16], index: 5, kind: input, shape index: {}]   ;;  %s2020_s6 = inlined_call_operand.vmem [shape: f32[1,16], index: 6, kind: input, shape index: {}]   ;;  %s2021_s7 = inlined_call_operand.vmem [shape: bf16[16,32], index: 7, kind: input, shape index: {}]   ;;  %s2022_s8 = inlined_call_operand.vmem [shape: f32[1,32], index: 8, kind: input, shape index: {}]   ;;  %s2023_s9 = inlined_call_operand.vmem [shape: bf16[256,128], index: 9, kind: input, shape index: {}]   ;;  %s2024_s10 = inlined_call_operand.vmem [shape: f32[1,128], index: 10, kind: input, shape index: {}]   ;;  %s2025_s11 = inlined_call_operand.vmem [shape: bf16[128,32], index: 11, kind: input, shape index: {}]   ;;  %s2026_s12 = inlined_call_operand.vmem [shape: f32[1,32], index: 12, kind: input, shape index: {}]   ;;  %s2027_s13 = inlined_call_operand.hbm [shape: f32[16,32], index: 13, kind: output, shape index: {0}]   ;;  %s2028_s14 = inlined_call_operand.vmem [shape: bf16[16,256], index: 14, kind: output, shape index: {1}]  }
   0x1   :  { %22 = vsyncpa [#allocation3 + $0x1], 0  ;;  %s1703_s29 = smov 0   ;;  %s1705_s30 = smov 0  }
   0x2   :  { %s1707_s15 = smov 0   ;;  %s1709_s16 = smov 0  }
   0x3 LB: > { %2036 = sst [smem:[#allocation5_spill]] %s1614_s15  ;;  %s1724_s17 = sadd.s32 4294967295, %s1618_s16   ;;  %s1618_s16 = sphi %s1709_s16, %s2046_s16   ;;  %s1614_s15 = sphi %s1707_s15, %s2051_s15   ;;  %s1610_s30 = sphi %s1705_s30, %s2050_s30   ;;  %s1606_s29 = sphi %s1703_s29, %s2049_s29  }
   0x4   : > { %s1293_s18 = sadd.s32 4294967294, %s1618_s16   ;;  %s1728_s19 = sadd.s32 1, %s1618_s16  }
   0x5   : > { %2037 = sst [smem:[#allocation6_spill]] %s1728_s19  ;;  %s313_s20 = sadd.s32 1, %s1614_s15 }
   0x6   : > { %s310_s21 = ssub.s32 %s1618_s16, %s1728_s19  ;;  %p323_p0 = scmp.ne.s32.totalorder %s1614_s15, %s1610_s30 }
   0x7   : > { %p311_p1 = scmp.eq.s32.totalorder %s310_s21, 0  ;;  %p324_p2 = scmp.eq.s32.totalorder %s1724_s17, 1 }
   0x8   : > { %p329_p3 = scmp.ne.s32.totalorder %s1610_s30, %s1606_s29  ;;  %p330_p4 = scmp.eq.s32.totalorder %s1293_s18, 1 }
   0x9   : > { %s1739_s22 = scalar_select %p311_p1, %s1614_s15, %s313_s20  }
   0xa   : > { %p1741_p5 = por %p324_p2, %p323_p0  ;;  %p1745_p6 = por %p330_p4, %p329_p3 }
   0xb   : > { %2038 = sst [smem:[#allocation7_spill]] %s1739_s22  ;;  %p1296_p7 = scmp.ge.s32.totalorder %s1618_s16, 1 }
   0xc   : > { %s2040_s24 = scalar_select %p1745_p6, 1, 0 }
   0xd   : > { %p417_p8 = scmp.lt.s32.totalorder %s1618_s16, 3 }
   0xe   : > { %2041 = sst [smem:[#allocation8_spill]] %s2040_s24 }
   0xf   : > { %p418_p9 = pnand %p1296_p7, %p417_p8 }
  0x10   : > { %v478_v0 = vld [vmem:[%s2015_s1] sm:$0xff] (!%p418_p9)  ;;  %v479_v1 = vld [vmem:[%s2015_s1 + $0x8] sm:$0xff] (!%p418_p9)  ;;  %v480_v2 = vld [vmem:[%s2015_s1 + $0x10] sm:$0xff] (!%p418_p9)  ;;  %v1620_v3 = vmov (!%p418_p9), 0.0|0.0   ;;  %vm1621_vm0 = vmmov (!%p418_p9), 0   ;;  %v1622_v6 = vmov (!%p418_p9), 0.0   ;;  %v584_v33 = vlaneseq (!%p418_p9) }
  0x11   : > { %421 = sbr.rel (%p418_p9) target bundleno = 1744 (0x6d0), region = 72  ;;  %1449 = vmatprep.subr.bf16.mxu0 (!%p418_p9), %v1620_v3  ;;  %v1450_v4 = vpack.c.bf16 (!%p418_p9), %v479_v1, %v478_v0  ;;  %v481_v5 = vld [vmem:[%s2015_s1 + $0x18] sm:$0xff] (!%p418_p9)  ;;  %1412 = vmatprep.mubr.msk.f32.mxu0 (!%p418_p9), %vm1621_vm0, %v1622_v6  ;;  %p467_p10 = scmp.lt.s32.totalorder (!%p418_p9), %s1724_s17, 1  ;;  %v1501_v7 = vld [vmem:[%s2017_s3 + $0x4] ss:$8 sps:$4 sm:$0xff] (!%p418_p9)   ;;  %vm490_vm1 = vcmask (!%p418_p9), 326656  }
  0x12   : > { %v1503_v8 = vld [vmem:[%s2017_s3] ss:$8 sps:$4 sm:$0xff] (!%p418_p9)   ;;  %v1453_v9 = vpack.c.bf16 (!%p418_p9), %v481_v5, %v480_v2  ;;  %v1504_v10 = vld [vmem:[%s2017_s3 + $0x14] ss:$8 sps:$4 sm:$0xff] (!%p418_p9)   ;;  %674 = vmatprep.subr.bf16.mxu1 (!%p418_p9), %v1501_v7  ;;  %v1506_v11 = vld [vmem:[%s2017_s3 + $0x10] ss:$8 sps:$4 sm:$0xff] (!%p418_p9)  }
  0x13   : > { %1451 = vmatpush3.bf16.msra.mxu0 (!%p418_p9), %v1450_v4  ;;  %675 = vmatpush1.bf16.msra.mxu1 (!%p418_p9), %v1503_v8  ;;  %v1507_v12 = vld [vmem:[%s2017_s3 + $0x24] ss:$8 sps:$4 sm:$0xff] (!%p418_p9)   ;;  %v1509_v15 = vld [vmem:[%s2017_s3 + $0x20] ss:$8 sps:$4 sm:$0xff] (!%p418_p9)   ;;  %v1510_v16 = vld [vmem:[%s2017_s3 + $0x34] ss:$8 sps:$4 sm:$0xff] (!%p418_p9)  }
  0x14   : > { %1452 = vmatprep.subr.bf16.mxu0 (!%p418_p9), %v1620_v3  ;;  %676 = vmatprep.subr.bf16.mxu1 (!%p418_p9), %v1504_v10  ;;  %v482_v13 = vld [vmem:[%s2015_s1 + $0x20] sm:$0xff] (!%p418_p9)  ;;  %v1512_v17 = vld [vmem:[%s2017_s3 + $0x30] ss:$8 sps:$4 sm:$0xff] (!%p418_p9)   ;;  %v1516_v20 = vld [vmem:[%s2017_s3 + $0x54] ss:$8 sps:$4 sm:$0xff] (!%p418_p9)   ;;  %v1623_v26 = vmov (!%p418_p9), 0  }
  0x15   : > { %v1513_v18 = vld [vmem:[%s2017_s3 + $0x44] ss:$8 sps:$4 sm:$0xff] (!%p418_p9)   ;;  %v1515_v19 = vld [vmem:[%s2017_s3 + $0x40] ss:$8 sps:$4 sm:$0xff] (!%p418_p9)   ;;  %v1518_v21 = vld [vmem:[%s2017_s3 + $0x50] ss:$8 sps:$4 sm:$0xff] (!%p418_p9)   ;;  %706 = vmatprep.mubr.bf16.mxu1 (!%p418_p9), %v1623_v26 }
  0x16   : > { %v1519_v22 = vld [vmem:[%s2017_s3 + $0x64] ss:$8 sps:$4 sm:$0xff] (!%p418_p9)   ;;  %v1521_v23 = vld [vmem:[%s2017_s3 + $0x60] ss:$8 sps:$4 sm:$0xff] (!%p418_p9)   ;;  %v1522_v24 = vld [vmem:[%s2017_s3 + $0x74] ss:$8 sps:$4 sm:$0xff] (!%p418_p9)  }
  0x17   : > { %1454 = vmatpush3.bf16.msra.mxu0 (!%p418_p9), %v1453_v9  ;;  %677 = vmatpush1.bf16.msra.mxu1 (!%p418_p9), %v1506_v11  ;;  %v1524_v25 = vld [vmem:[%s2017_s3 + $0x70] ss:$8 sps:$4 sm:$0xff] (!%p418_p9)   ;;  %v1301_v27 = vld [vmem:[%s2016_s2] ss:$0 sm:$0xff] (!%p418_p9)  ;;  %v585_v34 = vshrl.u32 (!%p418_p9), %v584_v33, 7  ;;  %v1526_v49 = vld [vmem:[%s2019_s5 + $0x8] sm:$0xff] (!%p418_p9)  }
  0x18   : > { %s1773_s18 = scalar_select %p467_p10, %s1724_s17, 1  ;;  %1410 = vmatprep.subr.mxu0 %v1622_v6  ;;  %678 = vmatprep.subr.bf16.mxu1 %v1507_v12  ;;  %v582_v36 = vld [vmem:[%s2018_s4] sm:$0x3]  ;;  %vm756_vm2 = vcmask 261120   ;;  %vm819_vm3 = vcmask 130048   ;;  %v1530_v10 = vld [vmem:[%s2023_s9 + $0x48] sm:$0xff]  }
  0x19   : > { %v586_v35 = vsub.s32 0, %v585_v34  ;;  %v590_v37 = vsub.s32 1, %v585_v34  ;;  %v1525_v48 = vld [vmem:[%s2019_s5] sm:$0xff]   ;;  %s2034_s19 = smov 32   ;;  %v1531_v11 = vld [vmem:[%s2023_s9 + $0x8] sm:$0xff]   ;;  %v1532_v12 = vld [vmem:[%s2023_s9 + $0x50] sm:$0xff]  }
  0x1a   : > { %s2033_s21 = sshll.u32 %s1773_s18, 3  ;;  %v1527_v60 = vld [vmem:[%s2021_s7] sm:$0xff]   ;;  %v1542_v33 = vld [vmem:[%s2023_s9 + $0x78] sm:$0xff]   ;;  %s1626_s28 = smov 96   ;;  %vm882_vm4 = vcmask 523264   ;;  %vm884_vm5 = vcmask 785408  }
  0x1b   : > { %s470_s15 = scalar_lea.vmem %s2014_s0, %s2033_s21  ;;  %1411 = vmatpush3.msra.mxu0 %v482_v13  ;;  %679 = vmatpush1.bf16.msra.mxu1 %v1509_v15  ;;  %v587_v38 = vrot.slane %v582_v36, %v586_v35  ;;  %v591_v39 = vrot.slane %v582_v36, %v590_v37  ;;  %v1319_v61 = vld [vmem:[%s2020_s6] ss:$0 sm:$0xff]  ;;  %v1533_v13 = vld [vmem:[%s2023_s9 + $0x10] sm:$0xff]   ;;  %v1535_v15 = vld [vmem:[%s2023_s9 + $0x18] sm:$0xff]  }
  0x1c   : > { %v477_v14 = vld [vmem:[%s470_s15] sm:$0xff]  ;;  %1415 = vmatprep.subr.bf16.mxu0 %v1622_v6  ;;  %680 = vmatprep.subr.bf16.mxu1 %v1510_v16  ;;  %s2035_s15 = smov 64   ;;  %v1543_v34 = vld [vmem:[%s2023_s9 + $0x38] sm:$0xff]   ;;  %v1545_v37 = vld [vmem:[%s2025_s11 + $0x8] sm:$0xff]  }
  0x1d   : > { %1413 = vmatmul.mubr.msk.f32.vlgmr.msra.gmra.mrb[0].mxu0 %vm490_vm1, %v477_v14  ;;  %v1528_v8 = vld [vmem:[%s2023_s9 + $0x40] sm:$0xff]   ;;  %v1534_v14 = vld [vmem:[%s2023_s9 + $0x58] sm:$0xff]  }
  0x1e   : > { %1419 = vmatprep.mubr.msk.bf16.mxu0 %vm1621_vm0, %v1622_v6  ;;  %1416 = vmatpush3.bf16.msra.mxu0 %v1525_v48  ;;  %v1529_v9 = vld [vmem:[%s2023_s9] sm:$0xff]  }
  0x1f   : > { %681 = vmatpush1.bf16.msra.mxu1 %v1512_v17  ;;  %1417 = vmatprep.subr.bf16.mxu0 %v1622_v6  ;;  %v1536_v16 = vld [vmem:[%s2023_s9 + $0x60] sm:$0xff]  }
  0x20   : > { %682 = vmatprep.subr.bf16.mxu1 %v1513_v18  ;;  %v1537_v17 = vld [vmem:[%s2023_s9 + $0x20] sm:$0xff]   ;;  %v1538_v18 = vld [vmem:[%s2023_s9 + $0x68] sm:$0xff]  }
  0x21   : > { %v1544_v35 = vld [vmem:[%s2025_s11] sm:$0xff]  }
  0x22   : > { %1418 = vmatpush3.bf16.msra.mxu0 %v1526_v49 }
  0x23   : > { %683 = vmatpush1.bf16.msra.mxu1 %v1515_v19  ;;  %1423 = vmatprep.subr.bf16.mxu0 %v1622_v6  ;;  %v1539_v19 = vld [vmem:[%s2023_s9 + $0x28] sm:$0xff]  }
  0x24   : > { %684 = vmatprep.subr.bf16.mxu1 %v1516_v20  ;;  %v1323_v20 = vld [vmem:[%s2022_s8] ss:$0 sm:$0xff] }
  0x27   : > { %685 = vmatpush1.bf16.msra.mxu1 %v1518_v21 }
  0x28   : > { %686 = vmatprep.subr.bf16.mxu1 %v1519_v22 }
  0x2b   : > { %687 = vmatpush1.bf16.msra.mxu1 %v1521_v23 }
  0x2c   : > { %688 = vmatprep.subr.bf16.mxu1 %v1522_v24 }
  0x2f   : > { %689 = vmatpush1.bf16.msra.mxu1 %v1524_v25 }
  0x30   : > { %1429 = vmatprep.subr.bf16.mxu1 %v1622_v6 }
  0xf0   : > { %v560_v28 = vpop.f32.mrb[0].mxu0 }
  0xf1   : > { %v561_v29 = vadd.f32 %v1301_v27, %v560_v28  ;;  %v1414_v30 = vpop.f32.mrb[1].mxu0 }
  0xf3   : > { %v564_v31 = vmax.f32 %v561_v29, 0.0 }
  0xf5   : > { %v565_v32 = vpack.c.bf16 %v564_v31, %v564_v31  ;;  %v1540_v31 = vld [vmem:[%s2023_s9 + $0x70] sm:$0xff]  }
  0xf7   : > { %707 = vmatmul.mubr.bf16.vlgmr.msra.gmra.mrb[0].mxu1 %v565_v32  ;;  %v1541_v32 = vld [vmem:[%s2023_s9 + $0x30] sm:$0xff]  }
  0xf8   : > { %1445 = vmatprep.mubr.msk.bf16.mxu1 %vm1621_vm0, %v1622_v6  ;;  %1430 = vmatpush3.bf16.msra.mxu1 %v1544_v35 }
  0xf9   : > { %1431 = vmatprep.subr.bf16.mxu1 %v1622_v6 }
  0xfc   : > { %1432 = vmatpush3.bf16.msra.mxu1 %v1545_v37 }
  0xfd   : > { %1433 = vmatprep.subr.bf16.mxu1 %v1622_v6 }
 0x1ca   : > { %v708_v40 = vpop.f32.mrb[0].mxu1 }
 0x1cb   : > { %v1839_v41 = vadd.f32 %v708_v40, %v587_v38  ;;  %v710_v42 = vpop.f32.mrb[1].mxu1  ;;  %v1546_v38 = vld [vmem:[%s2025_s11 + $0x10] sm:$0xff]   ;;  %v1548_v40 = vld [vmem:[%s2025_s11 + $0x20] sm:$0xff]  }
 0x1cc   : > { %v1841_v43 = vadd.f32 %v710_v42, %v591_v39  ;;  %v712_v44 = vpop.f32.mrb[2].mxu1  ;;  %1434 = vmatpush3.bf16.msra.mxu1 %v1546_v38  ;;  %v1547_v39 = vld [vmem:[%s2025_s11 + $0x18] sm:$0xff]   ;;  %v1549_v42 = vld [vmem:[%s2025_s11 + $0x28] sm:$0xff]  }
 0x1cd   : > { %v713_v45 = vpop.f32.mrb[3].mxu1  ;;  %1435 = vmatprep.subr.bf16.mxu1 %v1622_v6 }
 0x1ce   : > { %v715_v46 = vadd.f32 %v1841_v43, %v1839_v41  ;;  %v716_v47 = vmax.f32 %v1839_v41, %v1841_v43 }
 0x1d0   : > { %717 = vrot.lane.b32.xlu0 %v715_v46, %s2035_s15  ;;  %1436 = vmatpush3.bf16.msra.mxu1 %v1547_v39 }
 0x1d1   : > { %1437 = vmatprep.subr.bf16.mxu1 %v1622_v6 }
 0x1d4   : > { %722 = vrot.lane.b32.xlu0 %v716_v47, %s2035_s15  ;;  %s2042_s15 = smov 64   ;;  %1438 = vmatpush3.bf16.msra.mxu1 %v1548_v40 }
 0x1d5   : > { %1439 = vmatprep.subr.bf16.mxu1 %v1622_v6 }
 0x1d8   : > { %1440 = vmatpush3.bf16.msra.mxu1 %v1549_v42 }
 0x1d9   : > { %1441 = vmatprep.subr.bf16.mxu1 %v1622_v6 }
 0x242   : > { %v718_v50 = vpop.permute.xlu0 %717 }
 0x243   : > { %v721_v51 = vadd.f32 %v718_v50, %v715_v46 }
 0x245   : > { %725 = vrot.lane.b32.xlu1 %v721_v51, %s2034_s19 }
 0x246   : > { %v723_v52 = vpop.permute.xlu0 %722 }
 0x247   : > { %v724_v53 = vmax.f32 %v716_v47, %v723_v52 }
 0x249   : > { %728 = vrot.lane.b32.xlu1 %v724_v53, %s2034_s19  ;;  %s2043_s19 = smov 32  }
 0x2b7   : > { %v726_v54 = vpop.permute.xlu1 %725 }
 0x2b8   : > { %v727_v55 = vadd.f32 %v726_v54, %v721_v51 }
 0x2ba   : > { %v731_v57 = vmul.f32 0.125, %v727_v55  ;;  %v1550_v55 = vld [vmem:[%s2025_s11 + $0x30] sm:$0xff]  }
 0x2bb   : > { %v729_v56 = vpop.permute.xlu1 %728  ;;  %1442 = vmatpush3.bf16.msra.mxu1 %v1550_v55 }
 0x2bc   : > { %v730_v58 = vmax.f32 %v724_v53, %v729_v56  ;;  %1443 = vmatprep.subr.bf16.mxu1 %v1622_v6  ;;  %v1328_v56 = vld [vmem:[%s2024_s10] ss:$0 sm:$0xff] }
 0x2be   : > { %v732_v59 = vpack.c.bf16 %v730_v58, %v731_v57 }
 0x2c0   : > { %1420 = vmatmul.mubr.msk.bf16.vlgmr.msra.gmra.mrb[4].mxu0 %vm756_vm2, %v732_v59 }
 0x2c1   : > { %1425 = vmatprep.mubr.msk.bf16.mxu0 %vm1621_vm0, %v1622_v6  ;;  %1424 = vmatpush3.bf16.msra.mxu0 %v1527_v60  ;;  %v1345_v6 = vld [vmem:[%s2026_s12] ss:$0 sm:$0xff] }
 0x2c2   : > { %1371 = vmatprep.subr.bf16.mxu0 %v1528_v8 }
 0x393   : > { %v794_v62 = vpop.f32.mrb[4].mxu0 }
 0x394   : > { %v795_v63 = vadd.f32 %v1319_v61, %v794_v62  ;;  %v1421_v0 = vpop.f32.mrb[5].mxu0 }
 0x395   : > { %v797_v1 = vpop.f32.mrb[6].mxu0 }
 0x396   : > { %v798_v2 = vadd.f32 %v1319_v61, %v797_v1  ;;  %v1422_v3 = vpop.f32.mrb[7].mxu0  ;;  %v801_v4 = vmax.f32 %v795_v63, 0.0 }
 0x398   : > { %v802_v5 = vmax.f32 %v798_v2, 0.0 }
 0x39a   : > { %v803_v7 = vpack.c.bf16 %v802_v5, %v801_v4 }
 0x39c   : > { %1426 = vmatmul.mubr.msk.bf16.vlgmr.msra.gmra.mrb[8].mxu0 %vm819_vm3, %v803_v7 }
 0x39d   : > { %1372 = vmatpush3.bf16.msra.mxu0 %v1529_v9 }
 0x39e   : > { %1373 = vmatprep.subr.bf16.mxu0 %v1530_v10 }
 0x3a1   : > { %1374 = vmatpush3.bf16.msra.mxu0 %v1531_v11 }
 0x3a2   : > { %1375 = vmatprep.subr.bf16.mxu0 %v1532_v12 }
 0x3a5   : > { %1376 = vmatpush3.bf16.msra.mxu0 %v1533_v13 }
 0x3a6   : > { %1377 = vmatprep.subr.bf16.mxu0 %v1534_v14 }
 0x3a9   : > { %1378 = vmatpush3.bf16.msra.mxu0 %v1535_v15 }
 0x3aa   : > { %1379 = vmatprep.subr.bf16.mxu0 %v1536_v16 }
 0x3ad   : > { %1380 = vmatpush3.bf16.msra.mxu0 %v1537_v17 }
 0x3ae   : > { %1381 = vmatprep.subr.bf16.mxu0 %v1538_v18 }
 0x3b1   : > { %1382 = vmatpush3.bf16.msra.mxu0 %v1539_v19 }
 0x3b2   : > { %1383 = vmatprep.subr.bf16.mxu0 %v1540_v31 }
 0x3b5   : > { %1384 = vmatpush3.bf16.msra.mxu0 %v1541_v32 }
 0x3b6   : > { %1385 = vmatprep.subr.bf16.mxu0 %v1542_v33 }
 0x3b9   : > { %1386 = vmatpush3.bf16.msra.mxu0 %v1543_v34 }
 0x46f   : > { %v857_v21 = vpop.f32.mrb[8].mxu0 }
 0x470   : > { %v1427_v22 = vpop.f32.mrb[9].mxu0  ;;  %v858_v24 = vadd.f32 %v1323_v20, %v857_v21 }
 0x471   : > { %v860_v23 = vpop.f32.mrb[10].mxu0 }
 0x472   : > { %v861_v25 = vadd.f32 %v1323_v20, %v860_v23  ;;  %v1428_v26 = vpop.f32.mrb[11].mxu0 }
 0x474   : > { %v864_v27 = vadd.f32 %v861_v25, %v858_v24 }
 0x476   : > { %v1326_v28 = vmul.f32 -1.442695, %v864_v27 }
 0x478   : > { %1552 = vpow2.f32 %v1326_v28 }
 0x482   : > { %v1553_v29 = vpop.eup %1552 }
 0x483   : > { %v868_v30 = vadd.f32 1.0, %v1553_v29 }
 0x485   : > { %1554 = vrcp.f32 %v868_v30 }
 0x48f   : > { %v1555_v36 = vpop.eup %1554 }
 0x490   : > { %875 = vrot.lane.b32.xlu1 %v1555_v36, %s2042_s15  ;;  %872 = vrot.lane.b32.xlu0 %v1555_v36, %s2043_s19  ;;  %s2044_s19 = sshll.u32 %s1773_s18, 3  ;;  %s457_s15 = sand.u32 1, %s1610_s30  }
 0x494   : > { %878 = vrot.lane.b32.xlu0 %v1555_v36, %s1626_s28  ;;  %s475_s28 = scalar_lea.vmem %s2028_s14, %s2044_s19  ;;  %s1297_s19 = sshll.u32 %s457_s15, 3 }
 0x495   : > { %s459_s24 = scalar_lea.vmem [#allocation2], %s1297_s19  ;;  %s1627_s19 = smov [#allocation2]  }
 0x496   : > { %s1206_s22 = sshll.u32 %s459_s24, 4  ;;  %s1560_s26 = sshll.u32 %s1627_s19, 4  ;;  %s1973_s22 = int_to_ptr.vmem [resolvable:$true] %s1206_s22  ;;  %s1561_s26 = int_to_ptr.vmem [resolvable:$false] %s1560_s26 }
 0x497   : > { %s1556_s25 = scalar_lea.vmem %s1973_s22, 128  ;;  %s1562_s27 = scalar_lea.vmem %s1561_s26, 256 }
 0x498   : > { %p1557_p11 = scmp.ne.s32.totalorder %s1973_s22, %s1556_s25  ;;  %p1563_p0 = scmp.lt.s32.totalorder %s1973_s22, %s1561_s26 }
 0x499   : > { %p1564_p1 = scmp.lt.s32.totalorder %s1562_s27, %s1556_s25 }
 0x49a   : > { %p1558_p12 = pnand %p1557_p11, %p1741_p5 }
 0x49b   : > { %p1565_p2 = por %p1564_p1, %p1563_p0 }
 0x49c   : > { %p1559_p13 = pneg %p1558_p12 }
 0x49e   : > { %p1566_p3 = pnand %p1565_p2, %p1559_p13 }
 0x502   : > { %v873_v44 = vpop.permute.xlu0 %872  ;;  %v876_v45 = vpop.permute.xlu1 %875 }
 0x503   : > { %v881_v46 = vsel %vm756_vm2, %v1555_v36, %v873_v44 }
 0x504   : > { %v883_v47 = vsel %vm882_vm4, %v881_v46, %v876_v45 }
 0x506   : > { %v879_v48 = vpop.permute.xlu0 %878 }
 0x507   : > { %v885_v49 = vsel %vm884_vm5, %v883_v47, %v879_v48 }
 0x508   : > { %v886_v50 = vmul.f32 %v885_v49, %v1839_v41  ;;  %v887_v51 = vmul.f32 %v885_v49, %v1841_v43  ;;  %v1551_v41 = vld [vmem:[%s2025_s11 + $0x38] sm:$0xff]  }
 0x509   : > { %1444 = vmatpush3.bf16.msra.mxu1 %v1551_v41 }
 0x50a   : > { %v888_v52 = vpack.c.bf16 %v886_v50, %v886_v50  ;;  %v1359_v53 = vpack.c.bf16 %v887_v51, %v886_v50  ;;  %v889_v54 = vpack.c.bf16 %v887_v51, %v887_v51 }
 0x50c   : > { %896 = vst [vmem:[%s475_s28] sm:$0xff] %v1359_v53  ;;  %1064 = vmatprep.mubr.bf16.mxu0 %v889_v54  ;;  %s1355_s28 = sshll.u32 %s1724_s17, 7  ;;  %s1188_s17 = scalar_lea.sflag [#allocation3], %s457_s15 }
 0x50d   : > { %1065 = vmatmul.mubr.bf16.vlgmr.msra.gmra.mrb[12].mxu0 %v888_v52  ;;  %s1971_s21 = scalar_lea.hbm %s2027_s13, %s1355_s28 }
 0x5e0   : > { %v1387_v43 = vpop.f32.mrb[12].mxu0 }
 0x5e1   : > { %v1388_v57 = vpop.f32.mrb[13].mxu0 }
 0x5e2   : > { %v1389_v58 = vadd.f32 %v1388_v57, %v1387_v43  ;;  %v1390_v59 = vpop.f32.mrb[14].mxu0 }
 0x5e3   : > { %v1391_v60 = vpop.f32.mrb[15].mxu0 }
 0x5e4   : > { %v1067_v61 = vadd.f32 %v1389_v58, %v1328_v56 }
 0x5e6   : > { %v1072_v62 = vmax.f32 %v1067_v61, 0.0 }
 0x5e8   : > { %v1073_v63 = vpack.c.bf16 %v1072_v62, %v1072_v62 }
 0x5ea   : > { %1446 = vmatmul.mubr.bf16.vlgmr.msra.gmra.mrb[4].mxu1 %v1073_v63 }
 0x6bd   : > { %v1179_v0 = vpop.f32.mrb[4].mxu1 }
 0x6be   : > { %v1180_v1 = vadd.f32 %v1345_v6, %v1179_v0  ;;  %v1447_v2 = vpop.f32.mrb[5].mxu1 }
 0x6bf   : > { %v1182_v3 = vpop.f32.mrb[6].mxu1 }
 0x6c0   : > { %v1185_v4 = vmax.f32 %v1180_v1, 0.0  ;;  %v1448_v5 = vpop.f32.mrb[7].mxu1 }
 0x6c2   : > { %1186 = vst.msk [vmem:[%s459_s24] sm:$0xff] %vm756_vm2, %v1185_v4 }
 0x6c3   : > { %1569 = shalt.err (!%p1566_p3)
}
 0x6c4   : > { %s1570_s15 = scalar_lea.hbm %s1971_s21, 128  ;;  %s1574_s20 = scalar_lea.hbm %s2027_s13, 256 }
 0x6c5   : > { %p1571_p4 = scmp.ne.s32.totalorder %s1971_s21, %s1570_s15  ;;  %p1575_p9 = scmp.lt.u32.totalorder %s1971_s21, %s2027_s13 }
 0x6c6   : > { %p1576_p10 = scmp.lt.u32.totalorder %s1574_s20, %s1570_s15  ;;  %p1578_p12 = scmp.lt.u32.totalorder %s1570_s15, %s1971_s21 }
 0x6c7   : > { %p1572_p7 = pnand %p1571_p4, %p1741_p5 }
 0x6c8   : > { %p1577_p11 = por %p1576_p10, %p1575_p9 }
 0x6c9   : > { %p1573_p8 = pneg %p1572_p7 }
 0x6ca   : > { %p1579_p13 = por %p1578_p12, %p1577_p11 }
 0x6cc   : > { %p1580_p0 = pnand %p1579_p13, %p1573_p8 }
 0x6ce   : > { %1583 = shalt.err (!%p1580_p0)
}
 0x6cf   : > { %1455 = dma.vmem_to_hbm [thread:$0]  (%p1741_p5), %s1973_s22, 128, %s1971_s21, %s1188_s17  }
 0x6d0 PF: > { %p1461_p1 = scmp.ge.s32.totalorder %s1618_s16, 2  ;;  %s1221_s26 = sand.u32 1, %s1606_s29  }
 0x6d1   : > { %s1222_s27 = scalar_lea.sflag [#allocation3], %s1221_s26 }
 0x6d2   : > { %p1458_p2 = pnand %p1461_p1, %p1745_p6 }
 0x6d4   : > { %1601 = dma.done.wait (!%p1458_p2), %s1222_s27, 128  }
 0x6d5   : > { %1603 = vsyncadd (!%p1458_p2), %s1222_s27, 4294967168  ;;  %s2046_s16 = sld [smem:[#allocation6_spill]]  ;;  %s2047_s15 = sld [smem:[#allocation5_spill]] }
 0x6d6   : > { %s2048_s28 = sld [smem:[#allocation7_spill]]  ;;  %s2049_s29 = smov %s1610_s30 }
 0x6db   : > { %p25_p3 = scmp.ge.s32.totalorder %s2046_s16, 4   ;;  %s2050_s30 = smov %s2047_s15 }
 0x6dc   : > { %s2051_s15 = smov %s2048_s28 }
 0x6dd   :  { %27 = sbr.rel (!%p25_p3) target bundleno = 3 (0x3), region = 119 }
 0x6e4   :  { %1235 = vsyncpa [#allocation3], 1 }
 0x6e5   :  { %1237 = vsyncpa [#allocation3 + $0x1], 1 }

// kernel: _hcbam_core.3
= control target key start
LH: loop header
LB: loop body
LE: loop exit
PB: predicated region body
PF: predicated region fallthrough
CT: control target
= control target key end

     0   :  { %10 = vsyncpa [#allocation3], 0  ;;  %s804_s0 = inlined_call_operand.vmem [shape: f32[16,50], index: 0, kind: input, shape index: {}]   ;;  %s805_s1 = inlined_call_operand.vmem [shape: f32[50,25], index: 1, kind: input, shape index: {}]   ;;  %s806_s2 = inlined_call_operand.vmem [shape: f32[1,25], index: 2, kind: input, shape index: {}]   ;;  %s807_s3 = inlined_call_operand.vmem [shape: bf16[25,32], index: 3, kind: input, shape index: {}]   ;;  %s808_s4 = inlined_call_operand.vmem [shape: f32[1,32], index: 4, kind: input, shape index: {}]   ;;  %s809_s5 = inlined_call_operand.hbm [shape: f32[16,32], index: 5, kind: output, shape index: {}]  }
   0x1   :  { %12 = vsyncpa [#allocation3 + $0x1], 0  ;;  %s671_s18 = smov 0   ;;  %s673_s19 = smov 0  }
   0x2   :  { %s675_s20 = smov 0   ;;  %s677_s21 = smov 0  }
   0x3 LB: > { %s692_s22 = sadd.s32 4294967295, %s634_s21   ;;  %s465_s23 = sadd.s32 4294967294, %s634_s21   ;;  %s634_s21 = sphi %s677_s21, %s815_s21   ;;  %s630_s20 = sphi %s675_s20, %s814_s20   ;;  %s626_s19 = sphi %s673_s19, %s813_s19   ;;  %s622_s18 = sphi %s671_s18, %s812_s18  }
   0x4   : > { %s696_s24 = sadd.s32 1, %s634_s21   ;;  %s135_s25 = sadd.s32 1, %s630_s20 }
   0x5   : > { %s132_s26 = ssub.s32 %s634_s21, %s696_s24  ;;  %p145_p0 = scmp.ne.s32.totalorder %s630_s20, %s626_s19 }
   0x6   : > { %p133_p1 = scmp.eq.s32.totalorder %s132_s26, 0  ;;  %p146_p2 = scmp.eq.s32.totalorder %s692_s22, 1 }
   0x7   : > { %p151_p3 = scmp.ne.s32.totalorder %s626_s19, %s622_s18  ;;  %p152_p4 = scmp.eq.s32.totalorder %s465_s23, 1 }
   0x8   : > { %s707_s27 = scalar_select %p133_p1, %s630_s20, %s135_s25  }
   0x9   : > { %p709_p5 = por %p146_p2, %p145_p0  ;;  %p713_p6 = por %p152_p4, %p151_p3 }
   0xa   : > { %p468_p7 = scmp.ge.s32.totalorder %s634_s21, 1  ;;  %p189_p8 = scmp.lt.s32.totalorder %s634_s21, 3 }
   0xc   : > { %p190_p9 = pnand %p468_p7, %p189_p8 }
   0xd   : > { %v222_v0 = vld [vmem:[%s805_s1] sm:$0xff] (!%p190_p9)  ;;  %v223_v1 = vld [vmem:[%s805_s1 + $0x8] sm:$0xff] (!%p190_p9)  ;;  %v224_v2 = vld [vmem:[%s805_s1 + $0x10] sm:$0xff] (!%p190_p9)  ;;  %v636_v3 = vmov (!%p190_p9), 0.0|0.0   ;;  %p216_p10 = scmp.lt.s32.totalorder (!%p190_p9), %s692_s22, 1  ;;  %v637_v6 = vmov (!%p190_p9), 0.0  }
   0xe   : > { %193 = sbr.rel (%p190_p9) target bundleno = 477 (0x1dd), region = 40  ;;  %518 = vmatprep.subr.bf16.mxu0 (!%p190_p9), %v636_v3  ;;  %v519_v4 = vpack.c.bf16 (!%p190_p9), %v223_v1, %v222_v0  ;;  %v225_v5 = vld [vmem:[%s805_s1 + $0x18] sm:$0xff] (!%p190_p9)  ;;  %510 = vmatprep.subr.bf16.mxu1 (!%p190_p9), %v637_v6  ;;  %vm638_vm0 = vmmov (!%p190_p9), 0   ;;  %v226_v8 = vld [vmem:[%s805_s1 + $0x20] sm:$0xff] (!%p190_p9)  ;;  %v227_v9 = vld [vmem:[%s805_s1 + $0x28] sm:$0xff] (!%p190_p9)  ;;  %vm240_vm1 = vcmask (!%p190_p9), 1041408  }
   0xf   : > { %507 = vmatprep.mubr.msk.f32.mxu0 (!%p190_p9), %vm638_vm0, %v637_v6  ;;  %514 = vmatprep.mubr.msk.bf16.mxu1 (!%p190_p9), %vm638_vm0, %v637_v6  ;;  %v522_v7 = vpack.c.bf16 (!%p190_p9), %v225_v5, %v224_v2  ;;  %v525_v10 = vpack.c.bf16 (!%p190_p9), %v227_v9, %v226_v8  ;;  %v228_v11 = vld [vmem:[%s805_s1 + $0x30] sm:$0x3] (!%p190_p9)  ;;  %vm236_vm2 = vcmask (!%p190_p9), 408576   ;;  %v570_v13 = vld [vmem:[%s807_s3] sm:$0xff] (!%p190_p9)   ;;  %vm342_vm3 = vcmask (!%p190_p9), 1043456   ;;  %s213_s14 = sand.u32 (!%p190_p9), 1, %s626_s19  }
  0x10   : > { %520 = vmatpush3.bf16.msra.mxu0 (!%p190_p9), %v519_v4  ;;  %511 = vmatpush3.bf16.msra.mxu1 (!%p190_p9), %v570_v13  ;;  %v571_v14 = vld [vmem:[%s807_s3 + $0x8] sm:$0x1f] (!%p190_p9)   ;;  %vm343_vm4 = vcmask (!%p190_p9), 1044480   ;;  %v639_v15 = vmov (!%p190_p9), 65535   ;;  %v471_v19 = vld [vmem:[%s806_s2] ss:$0 sm:$0xff] (!%p190_p9) }
  0x11   : > { %521 = vmatprep.subr.bf16.mxu0 (!%p190_p9), %v636_v3  ;;  %v344_v16 = vsel (!%p190_p9), %vm342_vm3, 4294967295, %v639_v15  ;;  %512 = vmatprep.subr.bf16.mxu1 (!%p190_p9), %v637_v6  ;;  %vm338_vm5 = vcmask (!%p190_p9), 203776   ;;  %s469_s15 = sshll.u32 (!%p190_p9), %s213_s14, 3  ;;  %v474_v25 = vld [vmem:[%s808_s4] ss:$0 sm:$0xff] (!%p190_p9)  ;;  %vm390_vm6 = vcmask (!%p190_p9), 261120  }
  0x12   : > { %v345_v17 = vsel (!%p190_p9), %vm343_vm4, %v344_v16, 0  ;;  %s215_s25 = scalar_lea.vmem (!%p190_p9), [#allocation2], %s469_s15  ;;  %s640_s9 = smov (!%p190_p9), [#allocation2]  }
  0x13   : > { %v347_v18 = vand.u32 (!%p190_p9), %v571_v14, %v345_v17  ;;  %s406_s26 = sshll.u32 (!%p190_p9), %s215_s25, 4  ;;  %s576_s10 = sshll.u32 (!%p190_p9), %s640_s9, 4  ;;  %s764_s26 = int_to_ptr.vmem [resolvable:$true] %s406_s26  ;;  %s577_s10 = int_to_ptr.vmem [resolvable:$false] %s576_s10 }
  0x14   : > { %523 = vmatpush3.bf16.msra.mxu0 (!%p190_p9), %v522_v7  ;;  %s572_s8 = scalar_lea.vmem (!%p190_p9), %s764_s26, 128  ;;  %s578_s11 = scalar_lea.vmem (!%p190_p9), %s577_s10, 256 }
  0x15   : > { %s217_s13 = scalar_select %p216_p10, %s692_s22, 1  ;;  %524 = vmatprep.subr.bf16.mxu0 %v636_v3  ;;  %513 = vmatpush3.bf16.msra.mxu1 %v347_v18 }
  0x16   : > { %p573_p11 = scmp.ne.s32.totalorder %s764_s26, %s572_s8  ;;  %p579_p0 = scmp.lt.s32.totalorder %s764_s26, %s577_s10 }
  0x17   : > { %s470_s23 = sshll.u32 %s217_s13, 3  ;;  %p580_p1 = scmp.lt.s32.totalorder %s578_s11, %s572_s8 }
  0x18   : > { %s219_s30 = scalar_lea.vmem %s804_s0, %s470_s23  ;;  %526 = vmatpush3.bf16.msra.mxu0 %v525_v10  ;;  %s479_s23 = sshll.u32 %s692_s22, 7 }
  0x19   : > { %505 = vmatprep.subr.mxu0 %v637_v6  ;;  %v221_v12 = vld [vmem:[%s219_s30] sm:$0xff]  ;;  %s762_s7 = scalar_lea.hbm %s809_s5, %s479_s23  ;;  %s393_s22 = scalar_lea.sflag [#allocation3], %s213_s14 }
  0x1a   : > { %p574_p12 = pnand %p573_p11, %p709_p5  ;;  %p581_p2 = por %p580_p1, %p579_p0 }
  0x1c   : > { %506 = vmatpush3.msk.msra.mxu0 %vm240_vm1, %v228_v11  ;;  %p575_p13 = pneg %p574_p12 }
  0x1d   : > { %508 = vmatmul.mubr.msk.f32.vlgmr.msra.gmra.mrb[0].mxu0 %vm236_vm2, %v221_v12 }
  0x1e   : > { %p582_p3 = pnand %p581_p2, %p575_p13 }
  0xf0   : > { %v310_v20 = vpop.f32.mrb[0].mxu0 }
  0xf1   : > { %v311_v21 = vadd.f32 %v471_v19, %v310_v20  ;;  %v509_v22 = vpop.f32.mrb[1].mxu0 }
  0xf3   : > { %v314_v23 = vmax.f32 %v311_v21, 0.0 }
  0xf5   : > { %v315_v24 = vpack.c.bf16 %v314_v23, %v314_v23 }
  0xf7   : > { %515 = vmatmul.mubr.msk.bf16.vlgmr.msra.gmra.mrb[0].mxu1 %vm338_vm5, %v315_v24 }
 0x1ca   : > { %v383_v26 = vpop.f32.mrb[0].mxu1 }
 0x1cb   : > { %v384_v27 = vadd.f32 %v474_v25, %v383_v26  ;;  %v516_v28 = vpop.f32.mrb[1].mxu1 }
 0x1cc   : > { %v386_v29 = vpop.f32.mrb[2].mxu1 }
 0x1cd   : > { %v389_v30 = vmax.f32 %v384_v27, 0.0  ;;  %v517_v31 = vpop.f32.mrb[3].mxu1 }
 0x1cf   : > { %391 = vst.msk [vmem:[%s215_s25] sm:$0xff] %vm390_vm6, %v389_v30 }
 0x1d0   : > { %585 = shalt.err (!%p582_p3)
}
 0x1d1   : > { %s586_s12 = scalar_lea.hbm %s762_s7, 128  ;;  %s590_s15 = scalar_lea.hbm %s809_s5, 256 }
 0x1d2   : > { %p587_p4 = scmp.ne.s32.totalorder %s762_s7, %s586_s12  ;;  %p591_p9 = scmp.lt.u32.totalorder %s762_s7, %s809_s5 }
 0x1d3   : > { %p592_p10 = scmp.lt.u32.totalorder %s590_s15, %s586_s12  ;;  %p594_p12 = scmp.lt.u32.totalorder %s586_s12, %s762_s7 }
 0x1d4   : > { %p588_p7 = pnand %p587_p4, %p709_p5 }
 0x1d5   : > { %p593_p11 = por %p592_p10, %p591_p9 }
 0x1d6   : > { %p589_p8 = pneg %p588_p7 }
 0x1d7   : > { %p595_p13 = por %p594_p12, %p593_p11 }
 0x1d9   : > { %p596_p0 = pnand %p595_p13, %p589_p8 }
 0x1db   : > { %599 = shalt.err (!%p596_p0)
}
 0x1dc   : > { %527 = dma.vmem_to_hbm [thread:$0]  (%p709_p5), %s764_s26, 128, %s762_s7, %s393_s22  }
 0x1dd PF: > { %p533_p1 = scmp.ge.s32.totalorder %s634_s21, 2  ;;  %s418_s23 = sand.u32 1, %s622_s18  }
 0x1de   : > { %s419_s25 = scalar_lea.sflag [#allocation3], %s418_s23 }
 0x1df   : > { %p530_p2 = pnand %p533_p1, %p713_p6 }
 0x1e1   : > { %617 = dma.done.wait (!%p530_p2), %s419_s25, 128  }
 0x1e2   : > { %619 = vsyncadd (!%p530_p2), %s419_s25, 4294967168  ;;  %p15_p3 = scmp.ge.s32.totalorder %s696_s24, 4   ;;  %s812_s18 = smov %s626_s19 }
 0x1e3   : > { %s813_s19 = smov %s630_s20  ;;  %s814_s20 = smov %s707_s27 }
 0x1e4   : > { %s815_s21 = smov %s696_s24  ;;  %17 = sbr.rel (!%p15_p3) target bundleno = 3 (0x3), region = 75 }
 0x1eb   :  { %424 = vsyncpa [#allocation3], 1 }
 0x1ec   :  { %426 = vsyncpa [#allocation3 + $0x1], 1 }

</bundles_post_ra>
